<compile_context>
chip_gen: v6e
topology: v6e:2x2x1
jax: 0.10.0
libtpu: 0.0.40
codegen_flags: <defaults>
</compile_context>

<pallas_src>
import jax
import jax.numpy as jnp
from jax.experimental import pallas as pl
from jax.experimental.pallas import tpu as pltpu


def _scale_kernel(x_ref, w_ref, o_ref):
    # x_ref: (N, 1, T)     input tile, spatial flattened onto the lane axis
    # w_ref: (1, Cout, 1)  1x1 conv weights (lane-splat, sublane = channel)
    # o_ref: (N, Cout, T)  output tile, NCHW-ordered
    # One broadcast VPU multiply + one full-block (unmasked) store.
    o_ref[...] = x_ref[...] * w_ref[...]


def conv1x1_pallas(inp, weight, *, max_hw_block=16384):
    """1x1 conv, no bias. inp: (N, 1, H, W) NCHW. weight: (Cout, 1, 1, 1)."""
    n, cin, h, w = inp.shape
    assert cin == 1, "module has a single input channel"
    cout = weight.shape[0]
    hw = h * w

    # Flatten spatial onto the lane axis (free reshape).
    x3d = inp.reshape(n, 1, hw)
    w3d = weight.reshape(1, cout, 1)

    # Pad the lane axis to a multiple of 128 so stores are unmasked vst.
    hw_p = ((hw + 127) // 128) * 128
    if hw_p != hw:
        x3d = jnp.pad(x3d, ((0, 0), (0, 0), (0, hw_p - hw)))

    # Single step when small; tile the lane axis only when the double-buffered
    # working set would start to matter for VMEM (v7x is the tightest chip).
    if hw_p <= max_hw_block:
        t = hw_p
    else:
        t = max_hw_block  # multiple of 128
        if hw_p % t != 0:
            extra = t - (hw_p % t)
            x3d = jnp.pad(x3d, ((0, 0), (0, 0), (0, extra)))
            hw_p += extra
    grid_hw = hw_p // t

    out = pl.pallas_call(
        _scale_kernel,
        out_shape=jax.ShapeDtypeStruct((n, cout, hw_p), inp.dtype),
        grid_spec=pltpu.PrefetchScalarGridSpec(
            num_scalar_prefetch=0,
            grid=(grid_hw,),  # == (1,) at the test shape: single step
            in_specs=[
                pl.BlockSpec((n, 1, t), lambda i: (0, 0, i)),
                pl.BlockSpec((1, cout, 1), lambda i: (0, 0, 0)),
            ],
            out_specs=pl.BlockSpec((n, cout, t), lambda i: (0, 0, i)),
        ),
        compiler_params=pltpu.CompilerParams(
            dimension_semantics=("parallel",),
        ),
    )(x3d, w3d)

    # Drop lane padding (no-op when hw is already a multiple of 128) and
    # reshape back to NCHW — pure reshape, already channel-ordered.
    out = out[:, :, :hw]
    return out.reshape(n, cout, h, w)


if __name__ == "__main__":
    key = jax.random.PRNGKey(0)
    k_inp, k_w = jax.random.split(key)

    num_channels = 3          # Conv2d(1, num_channels, kernel_size=1, bias=False)
    n, h, w = 2, 16, 16

    inp = jax.random.normal(k_inp, (n, 1, h, w), dtype=jnp.float32)
    # deterministic weight init (shape matches PyTorch: (Cout, Cin, kH, kW))
    fan_in = 1 * 1 * 1
    bound = 1.0 / (fan_in ** 0.5)
    weight = jax.random.uniform(
        k_w, (num_channels, 1, 1, 1), dtype=jnp.float32,
        minval=-bound, maxval=bound,
    )

    out = conv1x1_pallas(inp, weight)
    out = jax.block_until_ready(out)

    # reference check in plain JAX (broadcast scale, NCHW)
    ref = inp * weight.reshape(1, num_channels, 1, 1)
    assert out.shape == (n, num_channels, h, w)
    assert jnp.allclose(out, ref, atol=1e-5, rtol=1e-5)

    print("KERNEL_OK")
</pallas_src>

<mosaic_0001>
module attributes {stable_mosaic.version = 11 : i64} {
  func.func @_scale_kernel(%arg0: i32, %arg1: memref<2x1x256xf32, #tpu.memory_space<vmem>>, %arg2: memref<1x3x1xf32, #tpu.memory_space<vmem>>, %arg3: memref<2x3x256xf32, #tpu.memory_space<vmem>>) attributes {dimension_semantics = [#tpu.dimension_semantics<parallel>], iteration_bounds = array<i64: 1>, scalar_prefetch = 0 : i64, scratch_operands = 0 : i64, tpu.core_type = #tpu.core_type<tc>, window_params = [{transform_indices = @transform_0, window_bounds = array<i64: 2, 1, 256>}, {pipeline_mode = #tpu.pipeline_mode<synchronous>, transform_indices = @transform_1, window_bounds = array<i64: 1, 3, 1>}, {transform_indices = @transform_2, window_bounds = array<i64: 2, 3, 256>}]} {
    %c0 = arith.constant 0 : index
    %c0_0 = arith.constant 0 : index
    %c0_1 = arith.constant 0 : index
    %0 = vector.load %arg1[%c0, %c0_0, %c0_1] : memref<2x1x256xf32, #tpu.memory_space<vmem>>, vector<2x1x256xf32>
    %c0_2 = arith.constant 0 : index
    %c0_3 = arith.constant 0 : index
    %c0_4 = arith.constant 0 : index
    %1 = vector.load %arg2[%c0_2, %c0_3, %c0_4] : memref<1x3x1xf32, #tpu.memory_space<vmem>>, vector<1x3x1xf32>
    %2 = vector.broadcast %0 : vector<2x1x256xf32> to vector<2x3x256xf32>
    %3 = vector.broadcast %1 : vector<1x3x1xf32> to vector<2x3x256xf32>
    %4 = arith.mulf %2, %3 : vector<2x3x256xf32>
    %c0_5 = arith.constant 0 : index
    %c0_6 = arith.constant 0 : index
    %c0_7 = arith.constant 0 : index
    %5 = vector.load %arg3[%c0_5, %c0_6, %c0_7] : memref<2x3x256xf32, #tpu.memory_space<vmem>>, vector<2x3x256xf32>
    tpu.vector_store %arg3[%c0_5, %c0_6, %c0_7], %4 {strides = array<i32>} : memref<2x3x256xf32, #tpu.memory_space<vmem>>, vector<2x3x256xf32>,
    return
  }
  func.func @transform_0(%arg0: i32) -> (i32, i32, i32) {
    %c0_i32 = arith.constant 0 : i32
    %c0_i32_0 = arith.constant 0 : i32
    %c0_i32_1 = arith.constant 0 : i32
    return %c0_i32, %c0_i32_0, %arg0 : i32, i32, i32
  }
  func.func @transform_1(%arg0: i32) -> (i32, i32, i32) {
    %c0_i32 = arith.constant 0 : i32
    %c0_i32_0 = arith.constant 0 : i32
    %c0_i32_1 = arith.constant 0 : i32
    %c0_i32_2 = arith.constant 0 : i32
    return %c0_i32, %c0_i32_0, %c0_i32_1 : i32, i32, i32
  }
  func.func @transform_2(%arg0: i32) -> (i32, i32, i32) {
    %c0_i32 = arith.constant 0 : i32
    %c0_i32_0 = arith.constant 0 : i32
    %c0_i32_1 = arith.constant 0 : i32
    return %c0_i32, %c0_i32_0, %arg0 : i32, i32, i32
  }
}

</mosaic_0001>

<bundles_post_ra>
// kernel: tpu_custom_call.1
= control target key start
LH: loop header
LB: loop body
LE: loop exit
PB: predicated region body
PF: predicated region fallthrough
CT: control target
= control target key end

     0   :  { %v61_v0 = vmov 0   ;;  %v16_v2 = vlaneseq  ;;  %s92_s1 = inlined_call_operand.vmem [shape: f32[1,3,1], index: 1, kind: input, shape index: {}]   ;;  %s93_s0 = inlined_call_operand.vmem [shape: f32[2,1,256], index: 0, kind: input, shape index: {}]   ;;  %s94_s2 = inlined_call_operand.vmem [shape: f32[2,3,256], index: 2, kind: output, shape index: {}]  }
   0x1   :  { %60 = vset.pattern.permute.xlu0 %v61_v0  ;;  %v13_v1 = vld [vmem:[%s92_s1] sm:$0x7] }
   0x2   :  { %38 = vperm.xlu0 %60, %v13_v1   ;;  %v17_v3 = vshrl.u32 %v16_v2, 7  ;;  %v11_v6 = vld [vmem:[%s93_s0] sm:$0x3]  ;;  %v12_v7 = vld [vmem:[%s93_s0 + $0x2] sm:$0x3] }
   0x4   :  { %v18_v4 = vsub.s32 0, %v17_v3  ;;  %v22_v5 = vsub.s32 1, %v17_v3 }
   0x6   :  { %v19_v8 = vrot.slane %v11_v6, %v18_v4  ;;  %v23_v9 = vrot.slane %v11_v6, %v22_v5  ;;  %v27_v10 = vrot.slane %v12_v7, %v18_v4  ;;  %v31_v11 = vrot.slane %v12_v7, %v22_v5 }
  0x7d   :  { %v39_v12 = vpop.permute.xlu0 %38 }
  0x7e   :  { %v41_v13 = vmul.f32 %v39_v12, %v19_v8  ;;  %v42_v14 = vmul.f32 %v39_v12, %v23_v9  ;;  %v43_v15 = vmul.f32 %v39_v12, %v27_v10  ;;  %v44_v16 = vmul.f32 %v39_v12, %v31_v11 }
  0x80   :  { %v49_v17 = vcombine.low %v41_v13, %v42_v14  ;;  %v50_v18 = vcombine.low %v43_v15, %v44_v16 }
  0x82   :  { %53 = vst [vmem:[%s94_s2] sm:$0x77] %v49_v17  ;;  %54 = vst [vmem:[%s94_s2 + $0x8] sm:$0x77] %v50_v18 }

</bundles_post_ra>
